<compile_context>
chip_gen: v6e
topology: v6e:2x2x1
jax: 0.10.0
libtpu: 0.0.40
codegen_flags: <defaults>
</compile_context>

<pallas_src>
import jax
import jax.numpy as jnp
from jax.experimental import pallas as pl
from jax.experimental.pallas import tpu as pltpu


DIM = 4          # self.dim
UNITS = 128      # nb_units (lane-aligned)
BATCH = 8        # small demo batch
BLOCK_B = 1024   # batch tile (columns per grid step)


def _round_up(n, m):
    return ((n + m - 1) // m) * m


# ---------------------------------------------------------------------------
# Kernel: fused q/p networks, batch-on-lanes layout.
#   xt_ref : (2*DIM,  TB)       columns = batch samples, rows = [q ; p]
#   wf_ref : (2*UNITS, 2*DIM)   block-diag [[W1_q, 0], [0, W1_p]]
#   b_ref  : (2*UNITS, 1)       [b1_q ; b1_p]
#   wb_ref : (2*DIM, 2*UNITS)   [[0, W1_p^T * w2_p], [-W1_q^T * w2_q, 0]]
#   out_ref: (2*DIM,  TB)       rows = [dq ; dp]
# ---------------------------------------------------------------------------
def hamiltonian_kernel(xt_ref, wf_ref, b_ref, wb_ref, out_ref):
    # Forward: z = [z_q ; z_p] for all batch columns in one MXU pass.
    z = jnp.dot(wf_ref[...], xt_ref[...],
                preferred_element_type=jnp.float32) + b_ref[...]
    t = jnp.tanh(z)
    s = 1.0 - t * t                                   # sech^2(z)
    # Backward: [dq ; dp] in one MXU pass (K = 2*UNITS); w2 scaling and the
    # minus sign for dp are pre-folded into wb, so no extra VPU work here.
    out_ref[...] = jnp.dot(wb_ref[...], s, preferred_element_type=jnp.float32)


def fuse_params(params):
    """One-time weight preparation into the fused block-diagonal layouts."""
    D, U = DIM, UNITS
    w1_q, w1_p = params["W1_q"], params["W1_p"]

    wf = jnp.zeros((2 * U, 2 * D), jnp.float32)
    wf = wf.at[:U, :D].set(w1_q).at[U:, D:].set(w1_p)

    wb = jnp.zeros((2 * D, 2 * U), jnp.float32)
    wb = wb.at[:D, U:].set(w1_p.T * params["w2_p"][None, :])      # dq rows
    wb = wb.at[D:, :U].set(-(w1_q.T * params["w2_q"][None, :]))   # dp rows

    b = jnp.concatenate([params["b1_q"], params["b1_p"]]).reshape(2 * U, 1)
    return {"wf": wf, "b": b, "wb": wb}


def hamiltonian_equation(x, fused, t=None, *, block_b=BLOCK_B):
    """x: (B, 2*DIM) -> (B, 2*DIM).  t is unused (time_augment=False)."""
    del t  # unused when time_augment=False (matches the reference module)
    B = x.shape[0]
    TB = min(block_b, _round_up(B, 128))   # lane-aligned batch tile
    Bp = _round_up(B, TB)
    grid = Bp // TB

    xt = x.T                               # (2*DIM, B): batch on lanes
    if Bp != B:
        xt = jnp.pad(xt, ((0, 0), (0, Bp - B)))

    out_t = pl.pallas_call(
        hamiltonian_kernel,
        out_shape=jax.ShapeDtypeStruct((2 * DIM, Bp), jnp.float32),
        grid=(grid,),
        in_specs=[
            pl.BlockSpec((2 * DIM, TB), lambda i: (0, i)),         # x^T tile
            pl.BlockSpec((2 * UNITS, 2 * DIM), lambda i: (0, 0)),  # wf (resident)
            pl.BlockSpec((2 * UNITS, 1), lambda i: (0, 0)),        # bias (resident)
            pl.BlockSpec((2 * DIM, 2 * UNITS), lambda i: (0, 0)),  # wb (resident)
        ],
        out_specs=pl.BlockSpec((2 * DIM, TB), lambda i: (0, i)),
        compiler_params=pltpu.CompilerParams(
            dimension_semantics=("parallel",)),
    )(xt, fused["wf"], fused["b"], fused["wb"])

    return out_t[:, :B].T                  # (B, 2*DIM) = [dq | dp]


# ---------------------------------------------------------------------------
# Pure-JAX reference mirroring the PyTorch autograd semantics.
# ---------------------------------------------------------------------------
def reference(x, params):
    def V(q):
        return jnp.sum(jnp.tanh(q @ params["W1_q"].T + params["b1_q"]) @ params["w2_q"])

    def K(p):
        return jnp.sum(jnp.tanh(p @ params["W1_p"].T + params["b1_p"]) @ params["w2_p"])

    q, p = x[:, :DIM], x[:, DIM:]
    dq = jax.grad(K)(p)
    dp = -jax.grad(V)(q)
    return jnp.concatenate([dq, dp], axis=1)


def init_params(key):
    ks = jax.random.split(key, 6)
    scale1 = 1.0 / jnp.sqrt(DIM)
    scale2 = 1.0 / jnp.sqrt(UNITS)
    return {
        "W1_q": jax.random.uniform(ks[0], (UNITS, DIM), jnp.float32, -scale1, scale1),
        "b1_q": jax.random.uniform(ks[1], (UNITS,), jnp.float32, -scale1, scale1),
        "w2_q": jax.random.uniform(ks[2], (UNITS,), jnp.float32, -scale2, scale2),
        "W1_p": jax.random.uniform(ks[3], (UNITS, DIM), jnp.float32, -scale1, scale1),
        "b1_p": jax.random.uniform(ks[4], (UNITS,), jnp.float32, -scale1, scale1),
        "w2_p": jax.random.uniform(ks[5], (UNITS,), jnp.float32, -scale2, scale2),
    }


if __name__ == "__main__":
    key = jax.random.PRNGKey(0)
    k_param, k_x1, k_x2 = jax.random.split(key, 3)
    params = init_params(k_param)
    fused = fuse_params(params)

    # Small batch (single grid step) and a larger, non-multiple-of-128 batch
    # (exercises padding + multi-step "parallel" grid).
    for B, kx in ((BATCH, k_x1), (2500, k_x2)):
        x = jax.random.normal(kx, (B, 2 * DIM), jnp.float32)
        out = jax.block_until_ready(hamiltonian_equation(x, fused))
        ref = reference(x, params)
        assert out.shape == (B, 2 * DIM)
        assert jnp.allclose(out, ref, atol=2e-5, rtol=2e-5), f"mismatch vs reference at B={B}"

    print("KERNEL_OK")
</pallas_src>

<mosaic_0001>
module attributes {stable_mosaic.version = 11 : i64} {
  func.func @hamiltonian_kernel(%arg0: i32, %arg1: memref<8x128xf32, #tpu.memory_space<vmem>>, %arg2: memref<256x8xf32, #tpu.memory_space<vmem>>, %arg3: memref<256x1xf32, #tpu.memory_space<vmem>>, %arg4: memref<8x256xf32, #tpu.memory_space<vmem>>, %arg5: memref<8x128xf32, #tpu.memory_space<vmem>>) attributes {dimension_semantics = [#tpu.dimension_semantics<parallel>], iteration_bounds = array<i64: 1>, scalar_prefetch = 0 : i64, scratch_operands = 0 : i64, tpu.core_type = #tpu.core_type<tc>, window_params = [{transform_indices = @transform_0, window_bounds = array<i64: 8, 128>}, {pipeline_mode = #tpu.pipeline_mode<synchronous>, transform_indices = @transform_1, window_bounds = array<i64: 256, 8>}, {pipeline_mode = #tpu.pipeline_mode<synchronous>, transform_indices = @transform_2, window_bounds = array<i64: 256, 1>}, {pipeline_mode = #tpu.pipeline_mode<synchronous>, transform_indices = @transform_3, window_bounds = array<i64: 8, 256>}, {transform_indices = @transform_4, window_bounds = array<i64: 8, 128>}]} {
    %c0 = arith.constant 0 : index
    %c0_0 = arith.constant 0 : index
    %0 = vector.load %arg2[%c0, %c0_0] : memref<256x8xf32, #tpu.memory_space<vmem>>, vector<256x8xf32>
    %c0_1 = arith.constant 0 : index
    %c0_2 = arith.constant 0 : index
    %1 = vector.load %arg1[%c0_1, %c0_2] : memref<8x128xf32, #tpu.memory_space<vmem>>, vector<8x128xf32>
    %cst = arith.constant dense<0.000000e+00> : vector<256x128xf32>
    %2 = tpu.matmul %0, %1, %cst {dimension_numbers = #tpu.dot_dimension_numbers<[1], [0], [0], [1], [0, 0, 1, 1], [], []>} : vector<256x8xf32>, vector<8x128xf32>, vector<256x128xf32> -> vector<256x128xf32>
    %c0_3 = arith.constant 0 : index
    %c0_4 = arith.constant 0 : index
    %3 = vector.load %arg3[%c0_3, %c0_4] : memref<256x1xf32, #tpu.memory_space<vmem>>, vector<256x1xf32>
    %4 = vector.broadcast %3 : vector<256x1xf32> to vector<256x128xf32>
    %5 = arith.addf %2, %4 : vector<256x128xf32>
    %6 = math.tanh %5 : vector<256x128xf32>
    %7 = arith.mulf %6, %6 : vector<256x128xf32>
    %cst_5 = arith.constant 1.000000e+00 : f32
    %8 = vector.broadcast %cst_5 : f32 to vector<256x128xf32>
    %9 = arith.subf %8, %7 : vector<256x128xf32>
    %c0_6 = arith.constant 0 : index
    %c0_7 = arith.constant 0 : index
    %10 = vector.load %arg4[%c0_6, %c0_7] : memref<8x256xf32, #tpu.memory_space<vmem>>, vector<8x256xf32>
    %cst_8 = arith.constant dense<0.000000e+00> : vector<8x128xf32>
    %11 = tpu.matmul %10, %9, %cst_8 {dimension_numbers = #tpu.dot_dimension_numbers<[1], [0], [0], [1], [0, 0, 1, 1], [], []>} : vector<8x256xf32>, vector<256x128xf32>, vector<8x128xf32> -> vector<8x128xf32>
    %c0_9 = arith.constant 0 : index
    %c0_10 = arith.constant 0 : index
    %12 = vector.load %arg5[%c0_9, %c0_10] : memref<8x128xf32, #tpu.memory_space<vmem>>, vector<8x128xf32>
    tpu.vector_store %arg5[%c0_9, %c0_10], %11 {strides = array<i32>} : memref<8x128xf32, #tpu.memory_space<vmem>>, vector<8x128xf32>,
    return
  }
  func.func @transform_0(%arg0: i32) -> (i32, i32) {
    %c0_i32 = arith.constant 0 : i32
    %c0_i32_0 = arith.constant 0 : i32
    return %c0_i32, %arg0 : i32, i32
  }
  func.func @transform_1(%arg0: i32) -> (i32, i32) {
    %c0_i32 = arith.constant 0 : i32
    %c0_i32_0 = arith.constant 0 : i32
    %c0_i32_1 = arith.constant 0 : i32
    return %c0_i32, %c0_i32_0 : i32, i32
  }
  func.func @transform_2(%arg0: i32) -> (i32, i32) {
    %c0_i32 = arith.constant 0 : i32
    %c0_i32_0 = arith.constant 0 : i32
    %c0_i32_1 = arith.constant 0 : i32
    return %c0_i32, %c0_i32_0 : i32, i32
  }
  func.func @transform_3(%arg0: i32) -> (i32, i32) {
    %c0_i32 = arith.constant 0 : i32
    %c0_i32_0 = arith.constant 0 : i32
    %c0_i32_1 = arith.constant 0 : i32
    return %c0_i32, %c0_i32_0 : i32, i32
  }
  func.func @transform_4(%arg0: i32) -> (i32, i32) {
    %c0_i32 = arith.constant 0 : i32
    %c0_i32_0 = arith.constant 0 : i32
    return %c0_i32, %arg0 : i32, i32
  }
}

</mosaic_0001>

<bundles_post_ra>
// kernel: tpu_custom_call.1
= control target key start
LH: loop header
LB: loop body
LE: loop exit
PB: predicated region body
PF: predicated region fallthrough
CT: control target
= control target key end

     0   :  { %vm243_vm0 = vcmask 64512   ;;  %v988_v4 = vmov 0   ;;  %s1302_s0 = inlined_call_operand.vmem [shape: f32[8,128], index: 0, kind: input, shape index: {}]   ;;  %s1303_s1 = inlined_call_operand.vmem [shape: f32[256,8], index: 1, kind: input, shape index: {}]   ;;  %s1304_s2 = inlined_call_operand.vmem [shape: f32[256,1], index: 2, kind: input, shape index: {}]   ;;  %s1305_s3 = inlined_call_operand.vmem [shape: f32[8,256], index: 3, kind: input, shape index: {}]   ;;  %s1306_s4 = inlined_call_operand.hbm [shape: f32[8,128], index: 4, kind: output, shape index: {}]  }
   0x1   :  { %v50_v0 = vld [vmem:[%s1302_s0] sm:$0xff]  ;;  %v19_v2 = vld [vmem:[%s1303_s1 + $0x8] sm:$0xff]  ;;  %v20_v3 = vld [vmem:[%s1303_s1 + $0x10] sm:$0xff]  ;;  %901 = vset.pattern.permute.xlu1 %v988_v4  ;;  %900 = vset.pattern.permute.xlu0 %v988_v4 }
   0x2   :  { %v18_v1 = vld [vmem:[%s1303_s1] sm:$0xff]  ;;  %848 = vmatprep.subr.mxu0 %v50_v0  ;;  %v81_v5 = vld [vmem:[%s1304_s2 + $0xf0] sm:$0xff]  ;;  %v21_v6 = vld [vmem:[%s1303_s1 + $0x18] sm:$0xff] }
   0x3   :  { %850 = vmatprep.mubr.msk.f32.mxu0 %vm243_vm0, %v18_v1  ;;  %849 = vmatpush3.msra.mxu0 %v50_v0  ;;  %v65_v7 = vld [vmem:[%s1304_s2 + $0x70] sm:$0xff]  ;;  %v22_v8 = vld [vmem:[%s1303_s1 + $0x20] sm:$0xff]  ;;  %v23_v9 = vld [vmem:[%s1303_s1 + $0x28] sm:$0xff] }
   0x4   :  { %851 = vmatmul.mubr.msk.f32.vlgmr.msra.gmra.mxu0 %vm243_vm0, %v19_v2  ;;  %235 = vperm.xlu1 %901, %v81_v5   ;;  %v64_v10 = vld [vmem:[%s1304_s2 + $0x68] sm:$0xff]  ;;  %v24_v11 = vld [vmem:[%s1303_s1 + $0x30] sm:$0xff]  ;;  %v82_v12 = vld [vmem:[%s1304_s2 + $0xf8] sm:$0xff] }
   0x5   :  { %853 = vmatprep.mubr.msk.f32.mxu0 %vm243_vm0, %v20_v3  ;;  %240 = vperm.xlu0 %900, %v82_v12   ;;  %v66_v13 = vld [vmem:[%s1304_s2 + $0x78] sm:$0xff]  ;;  %v63_v15 = vld [vmem:[%s1304_s2 + $0x60] sm:$0xff]  ;;  %v80_v17 = vld [vmem:[%s1304_s2 + $0xe8] sm:$0xff] }
   0x6   :  { %v25_v14 = vld [vmem:[%s1303_s1 + $0x38] sm:$0xff]  ;;  %v26_v16 = vld [vmem:[%s1303_s1 + $0x40] sm:$0xff]  ;;  %v27_v18 = vld [vmem:[%s1303_s1 + $0x48] sm:$0xff] }
   0x7   :  { %v62_v19 = vld [vmem:[%s1304_s2 + $0x58] sm:$0xff]  ;;  %v28_v20 = vld [vmem:[%s1303_s1 + $0x50] sm:$0xff]  ;;  %v79_v21 = vld [vmem:[%s1304_s2 + $0xe0] sm:$0xff] }
   0x8   :  { %854 = vmatmul.mubr.msk.f32.gmra.mxu0 %vm243_vm0, %v21_v6  ;;  %155 = vperm.xlu1 %901, %v65_v7   ;;  %v29_v22 = vld [vmem:[%s1303_s1 + $0x58] sm:$0xff]  ;;  %v61_v23 = vld [vmem:[%s1304_s2 + $0x50] sm:$0xff]  ;;  %v30_v24 = vld [vmem:[%s1303_s1 + $0x60] sm:$0xff] }
   0x9   :  { %856 = vmatprep.mubr.msk.f32.mxu0 %vm243_vm0, %v22_v8  ;;  %160 = vperm.xlu0 %900, %v66_v13  }
   0xc   :  { %857 = vmatmul.mubr.msk.f32.gmra.mxu0 %vm243_vm0, %v23_v9  ;;  %150 = vperm.xlu1 %901, %v64_v10  }
   0xd   :  { %859 = vmatprep.mubr.msk.f32.mxu0 %vm243_vm0, %v24_v11  ;;  %230 = vperm.xlu0 %900, %v80_v17  }
  0x10   :  { %860 = vmatmul.mubr.msk.f32.gmra.mxu0 %vm243_vm0, %v25_v14  ;;  %145 = vperm.xlu1 %901, %v63_v15  }
  0x11   :  { %862 = vmatprep.mubr.msk.f32.mxu0 %vm243_vm0, %v26_v16 }
  0x14   :  { %863 = vmatmul.mubr.msk.f32.gmra.mxu0 %vm243_vm0, %v27_v18  ;;  %140 = vperm.xlu1 %901, %v62_v19  }
  0x15   :  { %865 = vmatprep.mubr.msk.f32.mxu0 %vm243_vm0, %v28_v20 }
  0x16   :  { %9 = vsyncpa [#allocation3], 0  ;;  %225 = vperm.xlu0 %900, %v79_v21   ;;  %v78_v25 = vld [vmem:[%s1304_s2 + $0xd8] sm:$0xff]  ;;  %v31_v26 = vld [vmem:[%s1303_s1 + $0x68] sm:$0xff]  ;;  %s989_s12 = smov [#allocation2]  }
  0x17   :  { %v60_v27 = vld [vmem:[%s1304_s2 + $0x48] sm:$0xff]  ;;  %v32_v28 = vld [vmem:[%s1303_s1 + $0x70] sm:$0xff]  ;;  %v33_v30 = vld [vmem:[%s1303_s1 + $0x78] sm:$0xff]  ;;  %s740_s13 = sshll.u32 %s989_s12, 4  ;;  %s741_s13 = int_to_ptr.vmem [resolvable:$true] %s740_s13 }
  0x18   :  { %866 = vmatmul.mubr.msk.f32.gmra.mxu0 %vm243_vm0, %v29_v22  ;;  %135 = vperm.xlu1 %901, %v61_v23   ;;  %v77_v29 = vld [vmem:[%s1304_s2 + $0xd0] sm:$0xff]  ;;  %v59_v31 = vld [vmem:[%s1304_s2 + $0x40] sm:$0xff]  ;;  %v76_v33 = vld [vmem:[%s1304_s2 + $0xc8] sm:$0xff]  ;;  %s966_s14 = scalar_lea.vmem %s741_s13, 128  ;;  %p971_p1 = scmp.lt.s32.totalorder %s741_s13, %s741_s13 }
  0x19   :  { %868 = vmatprep.mubr.msk.f32.mxu0 %vm243_vm0, %v30_v24  ;;  %v34_v32 = vld [vmem:[%s1303_s1 + $0x80] sm:$0xff]  ;;  %v35_v34 = vld [vmem:[%s1303_s1 + $0x88] sm:$0xff]  ;;  %v58_v35 = vld [vmem:[%s1304_s2 + $0x38] sm:$0xff]  ;;  %p967_p0 = scmp.ne.s32.totalorder %s741_s13, %s966_s14  ;;  %p972_p2 = scmp.lt.s32.totalorder %s966_s14, %s966_s14 }
  0x1a   :  { %220 = vperm.xlu0 %900, %v78_v25   ;;  %v36_v36 = vld [vmem:[%s1303_s1 + $0x90] sm:$0xff]  ;;  %v75_v37 = vld [vmem:[%s1304_s2 + $0xc0] sm:$0xff]  ;;  %v37_v38 = vld [vmem:[%s1303_s1 + $0x98] sm:$0xff] }
  0x1b   :  { %v57_v39 = vld [vmem:[%s1304_s2 + $0x30] sm:$0xff]  ;;  %v38_v40 = vld [vmem:[%s1303_s1 + $0xa0] sm:$0xff]  ;;  %v74_v41 = vld [vmem:[%s1304_s2 + $0xb8] sm:$0xff]  ;;  %p973_p3 = por %p972_p2, %p971_p1 }
  0x1c   :  { %869 = vmatmul.mubr.msk.f32.gmra.mxu0 %vm243_vm0, %v31_v26  ;;  %130 = vperm.xlu1 %901, %v60_v27   ;;  %v39_v42 = vld [vmem:[%s1303_s1 + $0xa8] sm:$0xff]  ;;  %v40_v44 = vld [vmem:[%s1303_s1 + $0xb0] sm:$0xff]  ;;  %v41_v46 = vld [vmem:[%s1303_s1 + $0xb8] sm:$0xff] }
  0x1d   :  { %871 = vmatprep.mubr.msk.f32.mxu0 %vm243_vm0, %v32_v28  ;;  %v56_v43 = vld [vmem:[%s1304_s2 + $0x28] sm:$0xff]  ;;  %v73_v45 = vld [vmem:[%s1304_s2 + $0xb0] sm:$0xff]  ;;  %v55_v47 = vld [vmem:[%s1304_s2 + $0x20] sm:$0xff]  ;;  %p974_p4 = pnand %p973_p3, %p967_p0 }
  0x1e   :  { %215 = vperm.xlu0 %900, %v77_v29   ;;  %v42_v48 = vld [vmem:[%s1303_s1 + $0xc0] sm:$0xff]  ;;  %v72_v49 = vld [vmem:[%s1304_s2 + $0xa8] sm:$0xff]  ;;  %v54_v51 = vld [vmem:[%s1304_s2 + $0x18] sm:$0xff] }
  0x1f   :  { %v43_v50 = vld [vmem:[%s1303_s1 + $0xc8] sm:$0xff]  ;;  %v44_v52 = vld [vmem:[%s1303_s1 + $0xd0] sm:$0xff]  ;;  %v71_v53 = vld [vmem:[%s1304_s2 + $0xa0] sm:$0xff] }
  0x20   :  { %872 = vmatmul.mubr.msk.f32.gmra.mxu0 %vm243_vm0, %v33_v30  ;;  %125 = vperm.xlu1 %901, %v59_v31   ;;  %v45_v54 = vld [vmem:[%s1303_s1 + $0xd8] sm:$0xff]  ;;  %v53_v55 = vld [vmem:[%s1304_s2 + $0x10] sm:$0xff]  ;;  %v46_v56 = vld [vmem:[%s1303_s1 + $0xe0] sm:$0xff] }
  0x21   :  { %874 = vmatprep.mubr.msk.f32.mxu0 %vm243_vm0, %v34_v32  ;;  %v70_v57 = vld [vmem:[%s1304_s2 + $0x98] sm:$0xff]  ;;  %v47_v58 = vld [vmem:[%s1303_s1 + $0xe8] sm:$0xff]  ;;  %v48_v60 = vld [vmem:[%s1303_s1 + $0xf0] sm:$0xff] }
  0x22   :  { %210 = vperm.xlu0 %900, %v76_v33   ;;  %v52_v59 = vld [vmem:[%s1304_s2 + $0x8] sm:$0xff]  ;;  %v69_v61 = vld [vmem:[%s1304_s2 + $0x90] sm:$0xff]  ;;  %v49_v62 = vld [vmem:[%s1303_s1 + $0xf8] sm:$0xff] }
  0x23   :  { %v51_v63 = vld [vmem:[%s1304_s2] sm:$0xff]  ;;  %v68_v0 = vld [vmem:[%s1304_s2 + $0x88] sm:$0xff] }
  0x24   :  { %875 = vmatmul.mubr.msk.f32.gmra.mxu0 %vm243_vm0, %v35_v34  ;;  %120 = vperm.xlu1 %901, %v58_v35   ;;  %v67_v1 = vld [vmem:[%s1304_s2 + $0x80] sm:$0xff]  ;;  %v662_v2 = vld [vmem:[%s1305_s3 + $0x8] sm:$0xff] }
  0x25   :  { %877 = vmatprep.mubr.msk.f32.mxu0 %vm243_vm0, %v36_v36  ;;  %727 = vmatprep.mubr.f32.mxu1 %v662_v2 }
  0x26   :  { %205 = vperm.xlu0 %900, %v75_v37  }
  0x28   :  { %878 = vmatmul.mubr.msk.f32.gmra.mxu0 %vm243_vm0, %v37_v38  ;;  %115 = vperm.xlu1 %901, %v57_v39  }
  0x29   :  { %880 = vmatprep.mubr.msk.f32.mxu0 %vm243_vm0, %v38_v40 }
  0x2a   :  { %200 = vperm.xlu0 %900, %v74_v41  }
  0x2c   :  { %881 = vmatmul.mubr.msk.f32.gmra.mxu0 %vm243_vm0, %v39_v42  ;;  %110 = vperm.xlu1 %901, %v56_v43  }
  0x2d   :  { %883 = vmatprep.mubr.msk.f32.mxu0 %vm243_vm0, %v40_v44 }
  0x2e   :  { %195 = vperm.xlu0 %900, %v73_v45  }
  0x30   :  { %884 = vmatmul.mubr.msk.f32.gmra.mxu0 %vm243_vm0, %v41_v46  ;;  %105 = vperm.xlu1 %901, %v55_v47  }
  0x31   :  { %886 = vmatprep.mubr.msk.f32.mxu0 %vm243_vm0, %v42_v48 }
  0x32   :  { %190 = vperm.xlu0 %900, %v72_v49  }
  0x34   :  { %887 = vmatmul.mubr.msk.f32.gmra.mxu0 %vm243_vm0, %v43_v50  ;;  %100 = vperm.xlu1 %901, %v54_v51  }
  0x35   :  { %889 = vmatprep.mubr.msk.f32.mxu0 %vm243_vm0, %v44_v52 }
  0x36   :  { %185 = vperm.xlu0 %900, %v71_v53  }
  0x38   :  { %890 = vmatmul.mubr.msk.f32.gmra.mxu0 %vm243_vm0, %v45_v54  ;;  %95 = vperm.xlu1 %901, %v53_v55  }
  0x39   :  { %892 = vmatprep.mubr.msk.f32.mxu0 %vm243_vm0, %v46_v56 }
  0x3a   :  { %180 = vperm.xlu0 %900, %v70_v57  }
  0x3c   :  { %893 = vmatmul.mubr.msk.f32.gmra.mxu0 %vm243_vm0, %v47_v58  ;;  %90 = vperm.xlu1 %901, %v52_v59  }
  0x3d   :  { %895 = vmatprep.mubr.msk.f32.mxu0 %vm243_vm0, %v48_v60 }
  0x3e   :  { %175 = vperm.xlu0 %900, %v69_v61  }
  0x40   :  { %896 = vmatmul.mubr.msk.f32.gmra.mxu0 %vm243_vm0, %v49_v62  ;;  %85 = vperm.xlu1 %901, %v51_v63  }
  0x42   :  { %170 = vperm.xlu0 %900, %v68_v0  }
  0x46   :  { %165 = vperm.xlu0 %900, %v67_v1  }
  0x7f   :  { %v1245_v3 = vpop.permute.xlu1 %235 }
  0x80   :  { %v241_v4 = vpop.permute.xlu0 %240 }
  0x83   :  { %v156_v5 = vpop.permute.xlu1 %155 }
  0x84   :  { %v161_v6 = vpop.permute.xlu0 %160 }
  0x87   :  { %v151_v10 = vpop.permute.xlu1 %150 }
  0x88   :  { %v231_v11 = vpop.permute.xlu0 %230 }
  0x8b   :  { %v146_v15 = vpop.permute.xlu1 %145 }
  0x8f   :  { %v141_v20 = vpop.permute.xlu1 %140 }
  0x91   :  { %v226_v16 = vpop.permute.xlu0 %225 }
  0x93   :  { %v136_v25 = vpop.permute.xlu1 %135 }
  0x95   :  { %v221_v21 = vpop.permute.xlu0 %220 }
  0x97   :  { %v131_v30 = vpop.permute.xlu1 %130 }
  0x99   :  { %v216_v26 = vpop.permute.xlu0 %215 }
  0x9b   :  { %v126_v35 = vpop.permute.xlu1 %125 }
  0x9d   :  { %v211_v31 = vpop.permute.xlu0 %210 }
  0x9f   :  { %v121_v40 = vpop.permute.xlu1 %120 }
  0xa1   :  { %v206_v36 = vpop.permute.xlu0 %205 }
  0xa3   :  { %v116_v45 = vpop.permute.xlu1 %115 }
  0xa5   :  { %v201_v41 = vpop.permute.xlu0 %200 }
  0xa7   :  { %v111_v50 = vpop.permute.xlu1 %110 }
  0xa9   :  { %v196_v46 = vpop.permute.xlu0 %195 }
  0xab   :  { %v106_v59 = vpop.permute.xlu1 %105 }
  0xad   :  { %v191_v51 = vpop.permute.xlu0 %190 }
  0xb1   :  { %v186_v60 = vpop.permute.xlu0 %185 }
  0xc4   :  { %v1247_v7 = vpop.f32.mrf.mxu0 }
  0xc6   :  { %v1249_v8 = vpop.f32.mrf.mxu0 }
  0xc8   :  { %v1251_v9 = vpop.f32.mrf.mxu0 }
  0xca   :  { %v1253_v12 = vpop.f32.mrf.mxu0 }
  0xcc   :  { %v1255_v13 = vpop.f32.mrf.mxu0 }
  0xce   :  { %v1257_v14 = vpop.f32.mrf.mxu0 }
  0xd0   :  { %v1259_v17 = vpop.f32.mrf.mxu0 }
  0xd2   :  { %v1261_v18 = vpop.f32.mrf.mxu0 }
  0xd4   :  { %v1263_v19 = vpop.f32.mrf.mxu0 }
  0xd6   :  { %v1265_v22 = vpop.f32.mrf.mxu0 }
  0xd8   :  { %v867_v23 = vpop.f32.mrf.mxu0 }
  0xda   :  { %v456_v24 = vpop.f32.mrf.mxu0 }
  0xdc   :  { %v870_v27 = vpop.f32.mrf.mxu0 }
  0xdd   :  { %v472_v53 = vadd.f32 %v870_v27, %v151_v10  ;;  %v181_v27 = vpop.permute.xlu0 %180 }
  0xde   :  { %v466_v28 = vpop.f32.mrf.mxu0 }
  0xdf   :  { %902 = vtanh.f32 %v472_v53  ;;  %v467_v0 = vadd.f32 %v466_v28, %v146_v15  ;;  %v447_v15 = vadd.f32 %v1265_v22, %v126_v35  ;;  %v432_v35 = vadd.f32 %v1255_v13, %v111_v50 }
  0xe0   :  { %v873_v29 = vpop.f32.mrf.mxu0 }
  0xe1   :  { %v482_v54 = vadd.f32 %v873_v29, %v161_v6  ;;  %v462_v6 = vadd.f32 %v867_v23, %v141_v20  ;;  %v457_v29 = vadd.f32 %v456_v24, %v136_v25  ;;  %v442_v23 = vadd.f32 %v1259_v17, %v121_v40 }
  0xe2   :  { %v476_v32 = vpop.f32.mrf.mxu0 }
  0xe3   :  { %v477_v56 = vadd.f32 %v476_v32, %v156_v5  ;;  %904 = vtanh.f32 %v482_v54  ;;  %v101_v5 = vpop.permute.xlu1 %100 }
  0xe4   :  { %v1267_v33 = vpop.f32.mrf.mxu0 }
  0xe5   :  { %906 = vtanh.f32 %v477_v56 }
  0xe6   :  { %v1269_v34 = vpop.f32.mrf.mxu0 }
  0xe8   :  { %v1271_v37 = vpop.f32.mrf.mxu0 }
  0xea   :  { %v1273_v38 = vpop.f32.mrf.mxu0 }
  0xec   :  { %v1275_v39 = vpop.f32.mrf.mxu0  ;;  %v903_v20 = vpop.eup %902 }
  0xee   :  { %v1277_v42 = vpop.f32.mrf.mxu0 }
  0xef   :  { %v507_v40 = vadd.f32 %v1277_v42, %v186_v60 }
  0xf0   :  { %v885_v43 = vpop.f32.mrf.mxu0  ;;  %v905_v24 = vpop.eup %904 }
  0xf2   :  { %v516_v44 = vpop.f32.mrf.mxu0  ;;  %v907_v28 = vpop.eup %906 }
  0xf3   :  { %v517_v25 = vadd.f32 %v516_v44, %v196_v46  ;;  %v427_v46 = vadd.f32 %v1257_v14, %v106_v59 }
  0xf4   :  { %v888_v47 = vpop.f32.mrf.mxu0 }
  0xf5   :  { %v532_v32 = vadd.f32 %v888_v47, %v211_v31  ;;  %v512_v31 = vadd.f32 %v1275_v39, %v191_v51  ;;  %v611_v39 = vmul.f32 %v907_v28, %v907_v28  ;;  %v422_v51 = vadd.f32 %v1251_v9, %v101_v5 }
  0xf6   :  { %v526_v48 = vpop.f32.mrf.mxu0 }
  0xf8   :  { %v891_v49 = vpop.f32.mrf.mxu0 }
  0xf9   :  { %v542_v2 = vadd.f32 %v891_v49, %v221_v21  ;;  %v96_v21 = vpop.permute.xlu1 %95 }
  0xfa   :  { %v536_v52 = vpop.f32.mrf.mxu0  ;;  %v417_v56 = vadd.f32 %v1253_v12, %v96_v21 }
  0xfc   :  { %v894_v55 = vpop.f32.mrf.mxu0 }
  0xfd   :  { %v552_v57 = vadd.f32 %v894_v55, %v231_v11  ;;  %v537_v11 = vadd.f32 %v536_v52, %v216_v26  ;;  %v176_v26 = vpop.permute.xlu0 %175  ;;  %v91_v17 = vpop.permute.xlu1 %90  ;;  %v610_v52 = vmul.f32 %v903_v20, %v903_v20 }
  0xfe   :  { %v546_v58 = vpop.f32.mrf.mxu0  ;;  %v497_v54 = vadd.f32 %v1273_v38, %v176_v26 }
  0xff   :  { %v547_v61 = vadd.f32 %v546_v58, %v226_v16  ;;  %908 = vtanh.f32 %v552_v57  ;;  %v452_v16 = vadd.f32 %v1263_v19, %v131_v30  ;;  %v437_v19 = vadd.f32 %v1261_v18, %v116_v45 }
 0x100   :  { %v897_v62 = vpop.f32.mrf.mxu0  ;;  %v502_v45 = vadd.f32 %v1271_v37, %v181_v27  ;;  %v643_v57 = vsub.f32 1.0, %v611_v39 }
 0x101   :  { %v562_v63 = vadd.f32 %v897_v62, %v241_v4  ;;  %v527_v4 = vadd.f32 %v526_v48, %v206_v36  ;;  %v612_v36 = vmul.f32 %v905_v24, %v905_v24  ;;  %v171_v18 = vpop.permute.xlu0 %170  ;;  %v86_v60 = vpop.permute.xlu1 %85 }
 0x102   :  { %v556_v1 = vpop.f32.mrf.mxu0  ;;  %v492_v9 = vadd.f32 %v1267_v33, %v171_v18 }
 0x103   :  { %910 = vtanh.f32 %v562_v63  ;;  %v557_v10 = vadd.f32 %v556_v1, %v1245_v3  ;;  %v522_v3 = vadd.f32 %v885_v43, %v201_v41  ;;  %v644_v42 = vsub.f32 1.0, %v612_v36 }
 0x104   :  { %912 = vtanh.f32 %v547_v61  ;;  %v412_v63 = vadd.f32 %v1247_v7, %v91_v17  ;;  %v642_v1 = vsub.f32 1.0, %v610_v52 }
 0x105   :  { %914 = vtanh.f32 %v557_v10 }
 0x106   :  { %916 = vtanh.f32 %v467_v0  ;;  %v166_v0 = vpop.permute.xlu0 %165 }
 0x107   :  { %918 = vtanh.f32 %v542_v2  ;;  %v487_v10 = vadd.f32 %v1269_v34, %v166_v0 }
 0x108   :  { %920 = vtanh.f32 %v462_v6 }
 0x109   :  { %922 = vtanh.f32 %v537_v11  ;;  %v407_v11 = vadd.f32 %v1249_v8, %v86_v60 }
 0x10a   :  { %924 = vtanh.f32 %v457_v29 }
 0x10b   :  { %926 = vtanh.f32 %v532_v32 }
 0x10c   :  { %928 = vtanh.f32 %v452_v16  ;;  %v909_v30 = vpop.eup %908 }
 0x10d   :  { %930 = vtanh.f32 %v527_v4  ;;  %v626_v49 = vmul.f32 %v909_v30, %v909_v30 }
 0x10e   :  { %932 = vtanh.f32 %v447_v15 }
 0x10f   :  { %934 = vtanh.f32 %v522_v3  ;;  %v658_v61 = vsub.f32 1.0, %v626_v49 }
 0x110   :  { %v911_v22 = vpop.eup %910  ;;  %936 = vtanh.f32 %v442_v23 }
 0x111   :  { %v913_v41 = vpop.eup %912  ;;  %938 = vtanh.f32 %v517_v25  ;;  %v628_v43 = vmul.f32 %v911_v22, %v911_v22 }
 0x112   :  { %v915_v44 = vpop.eup %914  ;;  %940 = vtanh.f32 %v437_v19  ;;  %v625_v55 = vmul.f32 %v913_v41, %v913_v41 }
 0x113   :  { %v917_v47 = vpop.eup %916  ;;  %942 = vtanh.f32 %v512_v31  ;;  %v660_v48 = vsub.f32 1.0, %v628_v43  ;;  %v627_v13 = vmul.f32 %v915_v44, %v915_v44 }
 0x114   :  { %v919_v50 = vpop.eup %918  ;;  %944 = vtanh.f32 %v432_v35  ;;  %v609_v58 = vmul.f32 %v917_v47, %v917_v47  ;;  %v657_v6 = vsub.f32 1.0, %v625_v55 }
 0x115   :  { %v921_v53 = vpop.eup %920  ;;  %946 = vtanh.f32 %v507_v40  ;;  %813 = vmatprep.subr.mxu1 %v660_v48  ;;  %v659_v14 = vsub.f32 1.0, %v627_v13  ;;  %v624_v62 = vmul.f32 %v919_v50, %v919_v50 }
 0x116   :  { %v923_v37 = vpop.eup %922  ;;  %948 = vtanh.f32 %v427_v46  ;;  %814 = vmatpush3.msra.mxu1 %v644_v42  ;;  %v608_v12 = vmul.f32 %v921_v53, %v921_v53  ;;  %v641_v27 = vsub.f32 1.0, %v609_v58 }
 0x117   :  { %v925_v59 = vpop.eup %924  ;;  %950 = vtanh.f32 %v502_v45  ;;  %815 = vmatprep.subr.mxu1 %v659_v14  ;;  %v623_v5 = vmul.f32 %v923_v37, %v923_v37  ;;  %v656_v32 = vsub.f32 1.0, %v624_v62 }
 0x118   :  { %v927_v38 = vpop.eup %926  ;;  %952 = vtanh.f32 %v422_v51  ;;  %816 = vmatpush3.msra.mxu1 %v643_v57  ;;  %v607_v29 = vmul.f32 %v925_v59, %v925_v59  ;;  %v640_v34 = vsub.f32 1.0, %v608_v12 }
 0x119   :  { %v929_v2 = vpop.eup %928  ;;  %954 = vtanh.f32 %v497_v54  ;;  %817 = vmatprep.subr.mxu1 %v658_v61  ;;  %v622_v16 = vmul.f32 %v927_v38, %v927_v38  ;;  %v655_v3 = vsub.f32 1.0, %v623_v5 }
 0x11a   :  { %v931_v33 = vpop.eup %930  ;;  %956 = vtanh.f32 %v417_v56  ;;  %818 = vmatpush3.msra.mxu1 %v642_v1  ;;  %v606_v15 = vmul.f32 %v929_v2, %v929_v2  ;;  %v639_v23 = vsub.f32 1.0, %v607_v29 }
 0x11b   :  { %v933_v7 = vpop.eup %932  ;;  %958 = vtanh.f32 %v492_v9  ;;  %819 = vmatprep.subr.mxu1 %v657_v6  ;;  %v621_v20 = vmul.f32 %v931_v33, %v931_v33  ;;  %v654_v25 = vsub.f32 1.0, %v622_v16 }
 0x11c   :  { %v935_v4 = vpop.eup %934  ;;  %960 = vtanh.f32 %v412_v63  ;;  %820 = vmatpush3.msra.mxu1 %v641_v27  ;;  %v605_v26 = vmul.f32 %v933_v7, %v933_v7  ;;  %v638_v30 = vsub.f32 1.0, %v606_v15 }
 0x11d   :  { %v937_v21 = vpop.eup %936  ;;  %962 = vtanh.f32 %v487_v10  ;;  %821 = vmatprep.subr.mxu1 %v656_v32  ;;  %v620_v28 = vmul.f32 %v935_v4, %v935_v4  ;;  %v653_v35 = vsub.f32 1.0, %v621_v20 }
 0x11e   :  { %v939_v8 = vpop.eup %938  ;;  %964 = vtanh.f32 %v407_v11  ;;  %822 = vmatpush3.msra.mxu1 %v640_v34  ;;  %v604_v31 = vmul.f32 %v937_v21, %v937_v21  ;;  %v637_v17 = vsub.f32 1.0, %v605_v26  ;;  %v661_v11 = vld [vmem:[%s1305_s3] sm:$0xff] }
 0x11f   :  { %v941_v24 = vpop.eup %940  ;;  %823 = vmatprep.subr.mxu1 %v655_v3  ;;  %v619_v36 = vmul.f32 %v939_v8, %v939_v8  ;;  %v652_v44 = vsub.f32 1.0, %v620_v28 }
 0x120   :  { %v943_v19 = vpop.eup %942  ;;  %824 = vmatpush3.msra.mxu1 %v639_v23  ;;  %v603_v40 = vmul.f32 %v941_v24, %v941_v24  ;;  %v636_v45 = vsub.f32 1.0, %v604_v31 }
 0x121   :  { %v945_v22 = vpop.eup %944  ;;  %825 = vmatprep.subr.mxu1 %v654_v25  ;;  %v618_v46 = vmul.f32 %v943_v19, %v943_v19  ;;  %v651_v48 = vsub.f32 1.0, %v619_v36 }
 0x122   :  { %v947_v41 = vpop.eup %946  ;;  %826 = vmatpush3.msra.mxu1 %v638_v30  ;;  %v602_v39 = vmul.f32 %v945_v22, %v945_v22  ;;  %v635_v50 = vsub.f32 1.0, %v603_v40 }
 0x123   :  { %v949_v43 = vpop.eup %948  ;;  %827 = vmatprep.subr.mxu1 %v653_v35  ;;  %v617_v13 = vmul.f32 %v947_v41, %v947_v41  ;;  %v650_v52 = vsub.f32 1.0, %v618_v46 }
 0x124   :  { %v951_v18 = vpop.eup %950  ;;  %828 = vmatpush3.msra.mxu1 %v637_v17  ;;  %v601_v51 = vmul.f32 %v949_v43, %v949_v43  ;;  %v634_v14 = vsub.f32 1.0, %v602_v39 }
 0x125   :  { %v953_v47 = vpop.eup %952  ;;  %829 = vmatprep.subr.mxu1 %v652_v44  ;;  %v616_v53 = vmul.f32 %v951_v18, %v951_v18  ;;  %v649_v56 = vsub.f32 1.0, %v617_v13 }
 0x126   :  { %v955_v49 = vpop.eup %954  ;;  %830 = vmatpush3.msra.mxu1 %v636_v45  ;;  %v600_v55 = vmul.f32 %v953_v47, %v953_v47  ;;  %v633_v59 = vsub.f32 1.0, %v601_v51 }
 0x127   :  { %v957_v42 = vpop.eup %956  ;;  %831 = vmatprep.subr.mxu1 %v651_v48  ;;  %v615_v57 = vmul.f32 %v955_v49, %v955_v49  ;;  %v648_v61 = vsub.f32 1.0, %v616_v53 }
 0x128   :  { %v959_v54 = vpop.eup %958  ;;  %832 = vmatpush3.msra.mxu1 %v635_v50  ;;  %v599_v60 = vmul.f32 %v957_v42, %v957_v42  ;;  %v632_v38 = vsub.f32 1.0, %v600_v55 }
 0x129   :  { %v961_v37 = vpop.eup %960  ;;  %833 = vmatprep.subr.mxu1 %v650_v52  ;;  %v614_v62 = vmul.f32 %v959_v54, %v959_v54  ;;  %v647_v0 = vsub.f32 1.0, %v615_v57 }
 0x12a   :  { %v963_v58 = vpop.eup %962  ;;  %834 = vmatpush3.msra.mxu1 %v634_v14  ;;  %v598_v63 = vmul.f32 %v961_v37, %v961_v37  ;;  %v631_v12 = vsub.f32 1.0, %v599_v60 }
 0x12b   :  { %v965_v9 = vpop.eup %964  ;;  %835 = vmatprep.subr.mxu1 %v649_v56  ;;  %v613_v1 = vmul.f32 %v963_v58, %v963_v58  ;;  %v646_v10 = vsub.f32 1.0, %v614_v62 }
 0x12c   :  { %836 = vmatpush3.msra.mxu1 %v633_v59  ;;  %v597_v2 = vmul.f32 %v965_v9, %v965_v9  ;;  %v630_v6 = vsub.f32 1.0, %v598_v63 }
 0x12d   :  { %837 = vmatprep.subr.mxu1 %v648_v61  ;;  %v645_v5 = vsub.f32 1.0, %v613_v1 }
 0x12e   :  { %838 = vmatpush3.msra.mxu1 %v632_v38  ;;  %v629_v33 = vsub.f32 1.0, %v597_v2 }
 0x12f   :  { %839 = vmatprep.subr.mxu1 %v647_v0 }
 0x130   :  { %840 = vmatpush3.msra.mxu1 %v631_v12 }
 0x131   :  { %841 = vmatprep.subr.mxu1 %v646_v10 }
 0x132   :  { %842 = vmatpush3.msra.mxu1 %v630_v6 }
 0x133   :  { %843 = vmatprep.subr.mxu1 %v645_v5 }
 0x134   :  { %844 = vmatpush3.msra.mxu1 %v629_v33 }
 0x135   :  { %728 = vmatmul.mubr.f32.vlgmr.msra.gmra.mxu1 %v661_v11 }
 0x1f5   :  { %v845_v27 = vpop.f32.mrf.mxu1 }
 0x1f7   :  { %v846_v29 = vpop.f32.mrf.mxu1 }
 0x1f8   :  { %v847_v7 = vadd.f32 %v846_v29, %v845_v27 }
 0x1fa   :  { %733 = vst [vmem:[#allocation2] sm:$0xff] %v847_v7 }
 0x1fb   :  { %977 = shalt.err (!%p974_p4)
}
 0x1fc   :  { %743 = dma.vmem_to_hbm [thread:$0]  %s741_s13, 128, %s1306_s4, [#allocation3]  }
 0x1fd   :  { %986 = dma.done.wait [#allocation3], 128  }
 0x1fe   :  { %987 = vsyncadd [#allocation3], 4294967168 }
 0x1ff   :  { %747 = vsyncpa [#allocation3], 1 }

</bundles_post_ra>
